<compile_context>
chip_gen: v5e
topology: v5e:2x2
jax: 0.10.0
libtpu: 0.0.40
codegen_flags: <defaults>
</compile_context>

<pallas_src>
import functools
import math

import jax
import jax.numpy as jnp
from jax import lax
from jax.experimental import pallas as pl
from jax.experimental.pallas import tpu as pltpu


_LANE = 512            # lane-dense last dim (multiple of 128)
_MAX_BLOCK_ROWS = 512  # 512 x 512 f32 = 1 MiB per tile buffer (4 MiB with dbl-buffered in+out)

_SALTS = (0x3243F6A9, 0x85A308D3, 0x13198A2E, 0x03707344)
_CLT_N = 2 * len(_SALTS)                 # 8 uniform(0,1) draws per element
_CLT_SCALE = math.sqrt(12.0 / _CLT_N)    # standardize Irwin-Hall sum to unit variance


def _fmix32(h):
    """32-bit avalanche hash (lowbias32); uint32 -> uint32."""
    h = h ^ (h >> jnp.uint32(16))
    h = h * jnp.uint32(0x7FEB352D)
    h = h ^ (h >> jnp.uint32(15))
    h = h * jnp.uint32(0x846CA68B)
    h = h ^ (h >> jnp.uint32(16))
    return h


def _gaussian_noise_kernel(seed_ref, x_ref, o_ref, *, std, block_rows, lane):
    pid = pl.program_id(0)

    # Unique global element index for every element of this tile.  Counter-based
    # RNG => different tiles (and cores, with a "parallel" axis) are decorrelated
    # by construction; the scalar-prefetched seed selects the noise realization.
    row = lax.broadcasted_iota(jnp.int32, (block_rows, lane), 0) + pid * block_rows
    col = lax.broadcasted_iota(jnp.int32, (block_rows, lane), 1)
    idx = (row * lane + col).astype(jnp.uint32)

    seed_u = seed_ref[0].astype(jnp.uint32)
    key = idx ^ (seed_u * jnp.uint32(0x9E3779B9))

    # Standard-normal approximation: sum of 8 x 16-bit uniforms (CLT), f32 math.
    inv_2_16 = jnp.float32(1.0 / 65536.0)
    acc = jnp.zeros((block_rows, lane), jnp.float32)
    for salt in _SALTS:
        h = _fmix32(key + jnp.uint32(salt))
        lo = (h & jnp.uint32(0xFFFF)).astype(jnp.int32).astype(jnp.float32)
        hi = (h >> jnp.uint32(16)).astype(jnp.int32).astype(jnp.float32)
        # +1.0 centers the two uniforms -> each uniform has mean exactly 0.5.
        acc = acc + (lo + hi + jnp.float32(1.0)) * inv_2_16
    z = (acc - jnp.float32(_CLT_N / 2)) * jnp.float32(_CLT_SCALE)

    # Fused: x + randn * (std * x) == x * (1 + std * randn); compute f32, cast on store.
    xf = x_ref[...].astype(jnp.float32)
    o_ref[...] = (xf * (jnp.float32(1.0) + jnp.float32(std) * z)).astype(o_ref.dtype)


def gaussian_noise_forward(x, seed, *, std=0.1, training=True,
                           is_relative_detach=True):
    """Forward pass of gaussian_noise.

    x: float array of any shape (e.g. NCHW).
    seed: python int / int32 scalar selecting the noise realization.
    """
    del is_relative_detach  # only changes the gradient path; forward identical
    if (not training) or std == 0:
        return x

    orig_shape = x.shape
    total = x.size

    # Lane-dense 2D slab: (rows, 512), rows padded up to a multiple of the row tile.
    rows_needed = -(-total // _LANE)
    block_rows = min(_MAX_BLOCK_ROWS, ((rows_needed + 7) // 8) * 8)
    rows = -(-rows_needed // block_rows) * block_rows
    padded = rows * _LANE

    xf = x.reshape(-1)
    if padded != total:
        xf = jnp.pad(xf, (0, padded - total))
    x2 = xf.reshape(rows, _LANE)
    seed_arr = jnp.asarray([seed], dtype=jnp.int32)

    kernel = functools.partial(_gaussian_noise_kernel, std=float(std),
                               block_rows=block_rows, lane=_LANE)

    out2 = pl.pallas_call(
        kernel,
        out_shape=jax.ShapeDtypeStruct(x2.shape, x2.dtype),
        grid_spec=pltpu.PrefetchScalarGridSpec(
            num_scalar_prefetch=1,
            grid=(rows // block_rows,),
            in_specs=[pl.BlockSpec((block_rows, _LANE), lambda i, seed: (i, 0))],
            out_specs=pl.BlockSpec((block_rows, _LANE), lambda i, seed: (i, 0)),
        ),
        compiler_params=pltpu.CompilerParams(
            dimension_semantics=("parallel",)),
        # Elementwise in-place update: alias the tensor input (arg 1, after the
        # scalar-prefetch seed) to output 0 to avoid a second HBM buffer.
        input_output_aliases={1: 0},
    )(seed_arr, x2)

    return out2.reshape(-1)[:total].reshape(orig_shape)


if __name__ == "__main__":
    key = jax.random.PRNGKey(0)
    # Small NCHW input consistent with the module's generic elementwise forward.
    x = jax.random.normal(key, (2, 4, 16, 16), dtype=jnp.float32)

    # Training mode: noise is added.
    y = gaussian_noise_forward(x, seed=1234, std=0.1, training=True)
    y = jax.block_until_ready(y)
    assert y.shape == x.shape and y.dtype == x.dtype

    # Deterministic for a fixed seed.
    y2 = jax.block_until_ready(
        gaussian_noise_forward(x, seed=1234, std=0.1, training=True))
    assert jnp.array_equal(y, y2)

    # Eval mode (and std == 0) is the identity.
    assert jnp.array_equal(
        gaussian_noise_forward(x, seed=1234, std=0.1, training=False), x)
    assert jnp.array_equal(
        gaussian_noise_forward(x, seed=1234, std=0.0, training=True), x)

    # Noise statistics: out = x * (1 + std * z) with z ~ N(0, 1) approx,
    # so (y - x) / x should have mean ~0 and std ~0.1.
    rel = (y - x) / x
    assert abs(float(jnp.mean(rel))) < 0.03
    assert 0.05 < float(jnp.std(rel)) < 0.2

    print("KERNEL_OK")
</pallas_src>

<mosaic_0001>
module attributes {stable_mosaic.version = 11 : i64} {
  func.func @_gaussian_noise_kernel(%arg0: i32, %arg1: memref<1xi32, #tpu.memory_space<smem>>, %arg2: memref<8x512xf32, #tpu.memory_space<vmem>>, %arg3: memref<8x512xf32, #tpu.memory_space<vmem>>) attributes {dimension_semantics = [#tpu.dimension_semantics<parallel>], iteration_bounds = array<i64: 1>, scalar_prefetch = 1 : i64, scratch_operands = 0 : i64, tpu.core_type = #tpu.core_type<tc>, window_params = [{transform_indices = @transform_0, window_bounds = array<i64: 8, 512>}, {transform_indices = @transform_1, window_bounds = array<i64: 8, 512>}]} {
    %0 = tpu.iota {dimensions = array<i32: 0>} : vector<8x512xi32>
    %c8_i32 = arith.constant 8 : i32
    %1 = arith.muli %arg0, %c8_i32 : i32
    %2 = vector.broadcast %1 : i32 to vector<8x512xi32>
    %3 = arith.addi %0, %2 : vector<8x512xi32>
    %4 = tpu.iota {dimensions = array<i32: 1>} : vector<8x512xi32>
    %c512_i32 = arith.constant 512 : i32
    %5 = vector.broadcast %c512_i32 : i32 to vector<8x512xi32>
    %6 = arith.muli %3, %5 : vector<8x512xi32>
    %7 = arith.addi %6, %4 : vector<8x512xi32>
    %c0 = arith.constant 0 : index
    %8 = memref.load %arg1[%c0] : memref<1xi32, #tpu.memory_space<smem>>
    %c-1640531527_i32 = arith.constant -1640531527 : i32
    %9 = arith.muli %8, %c-1640531527_i32 : i32
    %10 = vector.broadcast %9 : i32 to vector<8x512xi32>
    %11 = arith.xori %7, %10 : vector<8x512xi32>
    %cst = arith.constant 0.000000e+00 : f32
    %12 = vector.broadcast %cst : f32 to vector<8x512xf32>
    %c843314857_i32 = arith.constant 843314857 : i32
    %13 = vector.broadcast %c843314857_i32 : i32 to vector<8x512xi32>
    %14 = arith.addi %11, %13 : vector<8x512xi32>
    %c16_i32 = arith.constant 16 : i32
    %15 = vector.broadcast %c16_i32 : i32 to vector<8x512xi32>
    %16 = arith.shrui %14, %15 : vector<8x512xi32>
    %17 = arith.xori %14, %16 : vector<8x512xi32>
    %c2146121005_i32 = arith.constant 2146121005 : i32
    %18 = vector.broadcast %c2146121005_i32 : i32 to vector<8x512xi32>
    %19 = arith.muli %17, %18 : vector<8x512xi32>
    %c15_i32 = arith.constant 15 : i32
    %20 = vector.broadcast %c15_i32 : i32 to vector<8x512xi32>
    %21 = arith.shrui %19, %20 : vector<8x512xi32>
    %22 = arith.xori %19, %21 : vector<8x512xi32>
    %c-2073254261_i32 = arith.constant -2073254261 : i32
    %23 = vector.broadcast %c-2073254261_i32 : i32 to vector<8x512xi32>
    %24 = arith.muli %22, %23 : vector<8x512xi32>
    %c16_i32_0 = arith.constant 16 : i32
    %25 = vector.broadcast %c16_i32_0 : i32 to vector<8x512xi32>
    %26 = arith.shrui %24, %25 : vector<8x512xi32>
    %27 = arith.xori %24, %26 : vector<8x512xi32>
    %c65535_i32 = arith.constant 65535 : i32
    %28 = vector.broadcast %c65535_i32 : i32 to vector<8x512xi32>
    %29 = arith.andi %27, %28 : vector<8x512xi32>
    %30 = arith.sitofp %29 : vector<8x512xi32> to vector<8x512xf32>
    %c16_i32_1 = arith.constant 16 : i32
    %31 = vector.broadcast %c16_i32_1 : i32 to vector<8x512xi32>
    %32 = arith.shrui %27, %31 : vector<8x512xi32>
    %33 = arith.sitofp %32 : vector<8x512xi32> to vector<8x512xf32>
    %34 = arith.addf %30, %33 : vector<8x512xf32>
    %cst_2 = arith.constant 1.000000e+00 : f32
    %35 = vector.broadcast %cst_2 : f32 to vector<8x512xf32>
    %36 = arith.addf %34, %35 : vector<8x512xf32>
    %cst_3 = arith.constant 1.52587891E-5 : f32
    %37 = vector.broadcast %cst_3 : f32 to vector<8x512xf32>
    %38 = arith.mulf %36, %37 : vector<8x512xf32>
    %39 = arith.addf %12, %38 : vector<8x512xf32>
    %c-2052912941_i32 = arith.constant -2052912941 : i32
    %40 = vector.broadcast %c-2052912941_i32 : i32 to vector<8x512xi32>
    %41 = arith.addi %11, %40 : vector<8x512xi32>
    %c16_i32_4 = arith.constant 16 : i32
    %42 = vector.broadcast %c16_i32_4 : i32 to vector<8x512xi32>
    %43 = arith.shrui %41, %42 : vector<8x512xi32>
    %44 = arith.xori %41, %43 : vector<8x512xi32>
    %c2146121005_i32_5 = arith.constant 2146121005 : i32
    %45 = vector.broadcast %c2146121005_i32_5 : i32 to vector<8x512xi32>
    %46 = arith.muli %44, %45 : vector<8x512xi32>
    %c15_i32_6 = arith.constant 15 : i32
    %47 = vector.broadcast %c15_i32_6 : i32 to vector<8x512xi32>
    %48 = arith.shrui %46, %47 : vector<8x512xi32>
    %49 = arith.xori %46, %48 : vector<8x512xi32>
    %c-2073254261_i32_7 = arith.constant -2073254261 : i32
    %50 = vector.broadcast %c-2073254261_i32_7 : i32 to vector<8x512xi32>
    %51 = arith.muli %49, %50 : vector<8x512xi32>
    %c16_i32_8 = arith.constant 16 : i32
    %52 = vector.broadcast %c16_i32_8 : i32 to vector<8x512xi32>
    %53 = arith.shrui %51, %52 : vector<8x512xi32>
    %54 = arith.xori %51, %53 : vector<8x512xi32>
    %c65535_i32_9 = arith.constant 65535 : i32
    %55 = vector.broadcast %c65535_i32_9 : i32 to vector<8x512xi32>
    %56 = arith.andi %54, %55 : vector<8x512xi32>
    %57 = arith.sitofp %56 : vector<8x512xi32> to vector<8x512xf32>
    %c16_i32_10 = arith.constant 16 : i32
    %58 = vector.broadcast %c16_i32_10 : i32 to vector<8x512xi32>
    %59 = arith.shrui %54, %58 : vector<8x512xi32>
    %60 = arith.sitofp %59 : vector<8x512xi32> to vector<8x512xf32>
    %61 = arith.addf %57, %60 : vector<8x512xf32>
    %cst_11 = arith.constant 1.000000e+00 : f32
    %62 = vector.broadcast %cst_11 : f32 to vector<8x512xf32>
    %63 = arith.addf %61, %62 : vector<8x512xf32>
    %cst_12 = arith.constant 1.52587891E-5 : f32
    %64 = vector.broadcast %cst_12 : f32 to vector<8x512xf32>
    %65 = arith.mulf %63, %64 : vector<8x512xf32>
    %66 = arith.addf %39, %65 : vector<8x512xf32>
    %c320440878_i32 = arith.constant 320440878 : i32
    %67 = vector.broadcast %c320440878_i32 : i32 to vector<8x512xi32>
    %68 = arith.addi %11, %67 : vector<8x512xi32>
    %c16_i32_13 = arith.constant 16 : i32
    %69 = vector.broadcast %c16_i32_13 : i32 to vector<8x512xi32>
    %70 = arith.shrui %68, %69 : vector<8x512xi32>
    %71 = arith.xori %68, %70 : vector<8x512xi32>
    %c2146121005_i32_14 = arith.constant 2146121005 : i32
    %72 = vector.broadcast %c2146121005_i32_14 : i32 to vector<8x512xi32>
    %73 = arith.muli %71, %72 : vector<8x512xi32>
    %c15_i32_15 = arith.constant 15 : i32
    %74 = vector.broadcast %c15_i32_15 : i32 to vector<8x512xi32>
    %75 = arith.shrui %73, %74 : vector<8x512xi32>
    %76 = arith.xori %73, %75 : vector<8x512xi32>
    %c-2073254261_i32_16 = arith.constant -2073254261 : i32
    %77 = vector.broadcast %c-2073254261_i32_16 : i32 to vector<8x512xi32>
    %78 = arith.muli %76, %77 : vector<8x512xi32>
    %c16_i32_17 = arith.constant 16 : i32
    %79 = vector.broadcast %c16_i32_17 : i32 to vector<8x512xi32>
    %80 = arith.shrui %78, %79 : vector<8x512xi32>
    %81 = arith.xori %78, %80 : vector<8x512xi32>
    %c65535_i32_18 = arith.constant 65535 : i32
    %82 = vector.broadcast %c65535_i32_18 : i32 to vector<8x512xi32>
    %83 = arith.andi %81, %82 : vector<8x512xi32>
    %84 = arith.sitofp %83 : vector<8x512xi32> to vector<8x512xf32>
    %c16_i32_19 = arith.constant 16 : i32
    %85 = vector.broadcast %c16_i32_19 : i32 to vector<8x512xi32>
    %86 = arith.shrui %81, %85 : vector<8x512xi32>
    %87 = arith.sitofp %86 : vector<8x512xi32> to vector<8x512xf32>
    %88 = arith.addf %84, %87 : vector<8x512xf32>
    %cst_20 = arith.constant 1.000000e+00 : f32
    %89 = vector.broadcast %cst_20 : f32 to vector<8x512xf32>
    %90 = arith.addf %88, %89 : vector<8x512xf32>
    %cst_21 = arith.constant 1.52587891E-5 : f32
    %91 = vector.broadcast %cst_21 : f32 to vector<8x512xf32>
    %92 = arith.mulf %90, %91 : vector<8x512xf32>
    %93 = arith.addf %66, %92 : vector<8x512xf32>
    %c57701188_i32 = arith.constant 57701188 : i32
    %94 = vector.broadcast %c57701188_i32 : i32 to vector<8x512xi32>
    %95 = arith.addi %11, %94 : vector<8x512xi32>
    %c16_i32_22 = arith.constant 16 : i32
    %96 = vector.broadcast %c16_i32_22 : i32 to vector<8x512xi32>
    %97 = arith.shrui %95, %96 : vector<8x512xi32>
    %98 = arith.xori %95, %97 : vector<8x512xi32>
    %c2146121005_i32_23 = arith.constant 2146121005 : i32
    %99 = vector.broadcast %c2146121005_i32_23 : i32 to vector<8x512xi32>
    %100 = arith.muli %98, %99 : vector<8x512xi32>
    %c15_i32_24 = arith.constant 15 : i32
    %101 = vector.broadcast %c15_i32_24 : i32 to vector<8x512xi32>
    %102 = arith.shrui %100, %101 : vector<8x512xi32>
    %103 = arith.xori %100, %102 : vector<8x512xi32>
    %c-2073254261_i32_25 = arith.constant -2073254261 : i32
    %104 = vector.broadcast %c-2073254261_i32_25 : i32 to vector<8x512xi32>
    %105 = arith.muli %103, %104 : vector<8x512xi32>
    %c16_i32_26 = arith.constant 16 : i32
    %106 = vector.broadcast %c16_i32_26 : i32 to vector<8x512xi32>
    %107 = arith.shrui %105, %106 : vector<8x512xi32>
    %108 = arith.xori %105, %107 : vector<8x512xi32>
    %c65535_i32_27 = arith.constant 65535 : i32
    %109 = vector.broadcast %c65535_i32_27 : i32 to vector<8x512xi32>
    %110 = arith.andi %108, %109 : vector<8x512xi32>
    %111 = arith.sitofp %110 : vector<8x512xi32> to vector<8x512xf32>
    %c16_i32_28 = arith.constant 16 : i32
    %112 = vector.broadcast %c16_i32_28 : i32 to vector<8x512xi32>
    %113 = arith.shrui %108, %112 : vector<8x512xi32>
    %114 = arith.sitofp %113 : vector<8x512xi32> to vector<8x512xf32>
    %115 = arith.addf %111, %114 : vector<8x512xf32>
    %cst_29 = arith.constant 1.000000e+00 : f32
    %116 = vector.broadcast %cst_29 : f32 to vector<8x512xf32>
    %117 = arith.addf %115, %116 : vector<8x512xf32>
    %cst_30 = arith.constant 1.52587891E-5 : f32
    %118 = vector.broadcast %cst_30 : f32 to vector<8x512xf32>
    %119 = arith.mulf %117, %118 : vector<8x512xf32>
    %120 = arith.addf %93, %119 : vector<8x512xf32>
    %cst_31 = arith.constant 4.000000e+00 : f32
    %121 = vector.broadcast %cst_31 : f32 to vector<8x512xf32>
    %122 = arith.subf %120, %121 : vector<8x512xf32>
    %cst_32 = arith.constant 1.22474492 : f32
    %123 = vector.broadcast %cst_32 : f32 to vector<8x512xf32>
    %124 = arith.mulf %122, %123 : vector<8x512xf32>
    %c0_33 = arith.constant 0 : index
    %c0_34 = arith.constant 0 : index
    %125 = vector.load %arg2[%c0_33, %c0_34] : memref<8x512xf32, #tpu.memory_space<vmem>>, vector<8x512xf32>
    %cst_35 = arith.constant 1.000000e-01 : f32
    %126 = vector.broadcast %cst_35 : f32 to vector<8x512xf32>
    %127 = arith.mulf %126, %124 : vector<8x512xf32>
    %cst_36 = arith.constant 1.000000e+00 : f32
    %128 = vector.broadcast %cst_36 : f32 to vector<8x512xf32>
    %129 = arith.addf %128, %127 : vector<8x512xf32>
    %130 = arith.mulf %125, %129 : vector<8x512xf32>
    %c0_37 = arith.constant 0 : index
    %c0_38 = arith.constant 0 : index
    %131 = vector.load %arg3[%c0_37, %c0_38] : memref<8x512xf32, #tpu.memory_space<vmem>>, vector<8x512xf32>
    tpu.vector_store %arg3[%c0_37, %c0_38], %130 {strides = array<i32>} : memref<8x512xf32, #tpu.memory_space<vmem>>, vector<8x512xf32>,
    return
  }
  func.func @transform_0(%arg0: i32, %arg1: memref<1xi32, #tpu.memory_space<smem>>) -> (i32, i32) {
    %c0_i32 = arith.constant 0 : i32
    %c0_i32_0 = arith.constant 0 : i32
    return %arg0, %c0_i32 : i32, i32
  }
  func.func @transform_1(%arg0: i32, %arg1: memref<1xi32, #tpu.memory_space<smem>>) -> (i32, i32) {
    %c0_i32 = arith.constant 0 : i32
    %c0_i32_0 = arith.constant 0 : i32
    return %arg0, %c0_i32 : i32, i32
  }
}

</mosaic_0001>

<bundles_post_ra>
// kernel: tpu_custom_call.1
= control target key start
LH: loop header
LB: loop body
LE: loop exit
PB: predicated region body
PF: predicated region fallthrough
CT: control target
= control target key end

     0   :  { %8 = vsyncpa [#allocation5], 0  ;;  %s460_s0 = inlined_call_operand.<no memory space> [shape: s32[1], index: 0, kind: input, shape index: {}]   ;;  %s461_s1 = inlined_call_operand.hbm [shape: f32[8,512], index: 1, kind: input, shape index: {}, may-alias: {1,2}]   ;;  %s462_s2 = inlined_call_operand.hbm [shape: f32[8,512], index: 2, kind: output, shape index: {}, may-alias: {1,2}]  }
   0x1   :  { %9 = vsyncpa [#allocation6], 0  ;;  %s15_s11 = sshll.u32 %s461_s1, 4  ;;  %s422_s12 = smov [#allocation4]   ;;  %s16_s11 = int_to_ptr.hbm [resolvable:$true] %s15_s11 }
   0x2   :  { %s17_s13 = sshll.u32 %s422_s12, 4  ;;  %s18_s13 = int_to_ptr.vmem [resolvable:$true] %s17_s13 }
   0x3   :  { %20 = dma.hbm_to_vmem [thread:$0]  %s16_s11, 512, %s18_s13, [#allocation5]  }
   0x4   :  { %418 = dma.done.wait [#allocation5], 512  }
   0x5   :  { %419 = vsyncadd [#allocation5], 4294966784  ;;  %v25_v0 = vlaneseq  ;;  %s41_s16 = smul.u32 2654435769, %s460_s0  ;;  %s423_s0 = smov [#allocation7]  }
   0x6   :  { %s352_s1 = sshll.u32 %s423_s0, 4  ;;  %s354_s19 = sshll.u32 %s462_s2, 4  ;;  %s353_s1 = int_to_ptr.vmem [resolvable:$true] %s352_s1  ;;  %s355_s19 = int_to_ptr.hbm [resolvable:$true] %s354_s19 }
   0x7   :  { %v26_v1 = vshrl.u32 %v25_v0, 7  ;;  %v31_v2 = vand.u32 127, %v25_v0  ;;  %v42_v7 = vstv %s41_s16 }
   0x9   :  { %v35_v3 = vmul.u32 512, %v26_v1  ;;  %v32_v4 = vadd.s32 128, %v31_v2  ;;  %v33_v5 = vadd.s32 256, %v31_v2  ;;  %v34_v6 = vadd.s32 384, %v31_v2 }
   0xb   :  { %v36_v8 = vadd.s32 %v35_v3, %v31_v2  ;;  %v37_v9 = vadd.s32 %v35_v3, %v32_v4  ;;  %v38_v10 = vadd.s32 %v35_v3, %v33_v5  ;;  %v39_v11 = vadd.s32 %v35_v3, %v34_v6 }
   0xd   :  { %v43_v12 = vxor.u32 %v42_v7, %v36_v8  ;;  %v44_v13 = vxor.u32 %v42_v7, %v37_v9  ;;  %v445_v17 = vxor.u32 %v42_v7, %v38_v10  ;;  %v447_v21 = vxor.u32 %v42_v7, %v39_v11 }
   0xf   :  { %v47_v14 = vadd.s32 843314857, %v43_v12  ;;  %v115_v15 = vadd.s32 2242054355, %v43_v12  ;;  %v183_v16 = vadd.s32 320440878, %v43_v12 }
  0x10   :  { %v251_v18 = vadd.s32 57701188, %v43_v12  ;;  %v48_v19 = vadd.s32 843314857, %v44_v13  ;;  %v116_v20 = vadd.s32 2242054355, %v44_v13 }
  0x11   :  { %v51_v22 = vshrl.u32 %v47_v14, 16  ;;  %v119_v23 = vshrl.u32 %v115_v15, 16  ;;  %v187_v24 = vshrl.u32 %v183_v16, 16  ;;  %v184_v25 = vadd.s32 320440878, %v44_v13 }
  0x12   :  { %v255_v26 = vshrl.u32 %v251_v18, 16  ;;  %v52_v27 = vshrl.u32 %v48_v19, 16  ;;  %v120_v28 = vshrl.u32 %v116_v20, 16  ;;  %v252_v29 = vadd.s32 57701188, %v44_v13 }
  0x13   :  { %v55_v30 = vxor.u32 %v51_v22, %v47_v14  ;;  %v123_v31 = vxor.u32 %v119_v23, %v115_v15  ;;  %v191_v32 = vxor.u32 %v187_v24, %v183_v16  ;;  %v188_v33 = vshrl.u32 %v184_v25, 16 }
  0x14   :  { %v259_v34 = vxor.u32 %v255_v26, %v251_v18  ;;  %v56_v35 = vxor.u32 %v52_v27, %v48_v19  ;;  %v124_v36 = vxor.u32 %v120_v28, %v116_v20  ;;  %v256_v37 = vshrl.u32 %v252_v29, 16 }
  0x15   :  { %v59_v38 = vmul.u32 2146121005, %v55_v30  ;;  %v127_v39 = vmul.u32 2146121005, %v123_v31  ;;  %v195_v40 = vmul.u32 2146121005, %v191_v32  ;;  %v192_v41 = vxor.u32 %v188_v33, %v184_v25 }
  0x16   :  { %v263_v42 = vmul.u32 2146121005, %v259_v34  ;;  %v60_v43 = vmul.u32 2146121005, %v56_v35  ;;  %v128_v44 = vmul.u32 2146121005, %v124_v36  ;;  %v260_v45 = vxor.u32 %v256_v37, %v252_v29 }
  0x17   :  { %v63_v46 = vshrl.u32 %v59_v38, 15  ;;  %v131_v47 = vshrl.u32 %v127_v39, 15  ;;  %v199_v48 = vshrl.u32 %v195_v40, 15  ;;  %v196_v49 = vmul.u32 2146121005, %v192_v41 }
  0x18   :  { %v267_v50 = vshrl.u32 %v263_v42, 15  ;;  %v64_v51 = vshrl.u32 %v60_v43, 15  ;;  %v132_v52 = vshrl.u32 %v128_v44, 15  ;;  %v264_v53 = vmul.u32 2146121005, %v260_v45 }
  0x19   :  { %v67_v54 = vxor.u32 %v63_v46, %v59_v38  ;;  %v135_v55 = vxor.u32 %v131_v47, %v127_v39  ;;  %v203_v56 = vxor.u32 %v199_v48, %v195_v40  ;;  %v200_v57 = vshrl.u32 %v196_v49, 15 }
  0x1a   :  { %v271_v58 = vxor.u32 %v267_v50, %v263_v42  ;;  %v68_v59 = vxor.u32 %v64_v51, %v60_v43  ;;  %v136_v60 = vxor.u32 %v132_v52, %v128_v44  ;;  %v268_v61 = vshrl.u32 %v264_v53, 15 }
  0x1b   :  { %v71_v62 = vmul.u32 2221713035, %v67_v54  ;;  %v139_v63 = vmul.u32 2221713035, %v135_v55  ;;  %v207_v0 = vmul.u32 2221713035, %v203_v56  ;;  %v204_v1 = vxor.u32 %v200_v57, %v196_v49 }
  0x1c   :  { %v275_v2 = vmul.u32 2221713035, %v271_v58  ;;  %v72_v3 = vmul.u32 2221713035, %v68_v59  ;;  %v140_v4 = vmul.u32 2221713035, %v136_v60  ;;  %v272_v5 = vxor.u32 %v268_v61, %v264_v53 }
  0x1d   :  { %v75_v6 = vshrl.u32 %v71_v62, 16  ;;  %v143_v7 = vshrl.u32 %v139_v63, 16  ;;  %v211_v8 = vshrl.u32 %v207_v0, 16  ;;  %v208_v9 = vmul.u32 2221713035, %v204_v1 }
  0x1e   :  { %v279_v10 = vshrl.u32 %v275_v2, 16  ;;  %v76_v11 = vshrl.u32 %v72_v3, 16  ;;  %v144_v12 = vshrl.u32 %v140_v4, 16  ;;  %v276_v13 = vmul.u32 2221713035, %v272_v5 }
  0x1f   :  { %v79_v14 = vxor.u32 %v75_v6, %v71_v62  ;;  %v147_v15 = vxor.u32 %v143_v7, %v139_v63  ;;  %v215_v16 = vxor.u32 %v211_v8, %v207_v0  ;;  %v212_v18 = vshrl.u32 %v208_v9, 16 }
  0x20   :  { %v283_v19 = vxor.u32 %v279_v10, %v275_v2  ;;  %v80_v20 = vxor.u32 %v76_v11, %v72_v3  ;;  %v148_v22 = vxor.u32 %v144_v12, %v140_v4  ;;  %v280_v23 = vshrl.u32 %v276_v13, 16 }
  0x21   :  { %v83_v24 = vand.u32 65535, %v79_v14  ;;  %v91_v25 = vshrl.u32 %v79_v14, 16  ;;  %v151_v26 = vand.u32 65535, %v147_v15  ;;  %v159_v27 = vshrl.u32 %v147_v15, 16 }
  0x22   :  { %v219_v28 = vand.u32 65535, %v215_v16  ;;  %v227_v29 = vshrl.u32 %v215_v16, 16  ;;  %v287_v30 = vand.u32 65535, %v283_v19  ;;  %v295_v31 = vshrl.u32 %v283_v19, 16 }
  0x23   :  { %v87_v32 = vcvt.s32.f32 %v83_v24  ;;  %v95_v33 = vcvt.s32.f32 %v91_v25  ;;  %v155_v34 = vcvt.s32.f32 %v151_v26  ;;  %v163_v35 = vcvt.s32.f32 %v159_v27 }
  0x24   :  { %v223_v36 = vcvt.s32.f32 %v219_v28  ;;  %v231_v37 = vcvt.s32.f32 %v227_v29  ;;  %v291_v38 = vcvt.s32.f32 %v287_v30  ;;  %v299_v39 = vcvt.s32.f32 %v295_v31 }
  0x25   :  { %v99_v40 = vadd.f32 %v95_v33, %v87_v32  ;;  %v167_v41 = vadd.f32 %v163_v35, %v155_v34  ;;  %v84_v42 = vand.u32 65535, %v80_v20  ;;  %v92_v43 = vshrl.u32 %v80_v20, 16 }
  0x26   :  { %v235_v44 = vadd.f32 %v231_v37, %v223_v36  ;;  %v303_v45 = vadd.f32 %v299_v39, %v291_v38  ;;  %v152_v46 = vand.u32 65535, %v148_v22  ;;  %v160_v47 = vshrl.u32 %v148_v22, 16 }
  0x27   :  { %v103_v48 = vadd.f32 1.0, %v99_v40  ;;  %v171_v49 = vadd.f32 1.0, %v167_v41  ;;  %v88_v50 = vcvt.s32.f32 %v84_v42  ;;  %v96_v51 = vcvt.s32.f32 %v92_v43 }
  0x28   :  { %v239_v52 = vadd.f32 1.0, %v235_v44  ;;  %v307_v53 = vadd.f32 1.0, %v303_v45  ;;  %v156_v54 = vcvt.s32.f32 %v152_v46  ;;  %v164_v55 = vcvt.s32.f32 %v160_v47  ;;  %v327_v45 = vld [vmem:[#allocation4] sm:$0xff] }
  0x29   :  { %v107_v56 = vmul.f32 1.5258789e-05, %v103_v48  ;;  %v175_v57 = vmul.f32 1.5258789e-05, %v171_v49  ;;  %v100_v58 = vadd.f32 %v96_v51, %v88_v50  ;;  %v216_v59 = vxor.u32 %v212_v18, %v208_v9 }
  0x2a   :  { %v243_v60 = vmul.f32 1.5258789e-05, %v239_v52  ;;  %v311_v61 = vmul.f32 1.5258789e-05, %v307_v53  ;;  %v168_v62 = vadd.f32 %v164_v55, %v156_v54  ;;  %v284_v63 = vxor.u32 %v280_v23, %v276_v13 }
  0x2b   :  { %v179_v0 = vadd.f32 %v175_v57, %v107_v56  ;;  %v104_v1 = vadd.f32 1.0, %v100_v58  ;;  %v220_v2 = vand.u32 65535, %v216_v59  ;;  %v228_v3 = vshrl.u32 %v216_v59, 16 }
  0x2c   :  { %v172_v4 = vadd.f32 1.0, %v168_v62  ;;  %v288_v5 = vand.u32 65535, %v284_v63  ;;  %v296_v6 = vshrl.u32 %v284_v63, 16  ;;  %v49_v7 = vadd.s32 843314857, %v445_v17 }
  0x2d   :  { %v247_v8 = vadd.f32 %v243_v60, %v179_v0  ;;  %v108_v10 = vmul.f32 1.5258789e-05, %v104_v1  ;;  %v224_v11 = vcvt.s32.f32 %v220_v2  ;;  %v232_v12 = vcvt.s32.f32 %v228_v3 }
  0x2e   :  { %v176_v14 = vmul.f32 1.5258789e-05, %v172_v4  ;;  %v292_v15 = vcvt.s32.f32 %v288_v5  ;;  %v300_v9 = vcvt.s32.f32 %v296_v6  ;;  %v53_v16 = vshrl.u32 %v49_v7, 16 }
  0x2f   :  { %v315_v18 = vadd.f32 %v311_v61, %v247_v8  ;;  %v236_v19 = vadd.f32 %v232_v12, %v224_v11  ;;  %v117_v13 = vadd.s32 2242054355, %v445_v17  ;;  %v185_v20 = vadd.s32 320440878, %v445_v17  ;;  %v328_v12 = vld [vmem:[#allocation4 + $0x8] sm:$0xff] }
  0x30   :  { %v180_v22 = vadd.f32 %v176_v14, %v108_v10  ;;  %v304_v23 = vadd.f32 %v300_v9, %v292_v15  ;;  %v57_v24 = vxor.u32 %v53_v16, %v49_v7  ;;  %v253_v25 = vadd.s32 57701188, %v445_v17 }
  0x31   :  { %v364_v26 = vadd.f32 -4.0, %v315_v18  ;;  %v240_v27 = vadd.f32 1.0, %v236_v19  ;;  %v121_v28 = vshrl.u32 %v117_v13, 16  ;;  %v189_v29 = vshrl.u32 %v185_v20, 16 }
  0x32   :  { %v308_v30 = vadd.f32 1.0, %v304_v23  ;;  %v61_v31 = vmul.u32 2146121005, %v57_v24  ;;  %v257_v32 = vshrl.u32 %v253_v25, 16  ;;  %v50_v33 = vadd.s32 843314857, %v447_v21 }
  0x33   :  { %v323_v34 = vmul.f32 1.2247449, %v364_v26  ;;  %v244_v35 = vmul.f32 1.5258789e-05, %v240_v27  ;;  %v125_v36 = vxor.u32 %v121_v28, %v117_v13  ;;  %v193_v37 = vxor.u32 %v189_v29, %v185_v20 }
  0x34   :  { %v312_v38 = vmul.f32 1.5258789e-05, %v308_v30  ;;  %v65_v39 = vshrl.u32 %v61_v31, 15  ;;  %v261_v40 = vxor.u32 %v257_v32, %v253_v25  ;;  %v54_v41 = vshrl.u32 %v50_v33, 16 }
  0x35   :  { %v331_v42 = vmul.f32 0.1, %v323_v34  ;;  %v248_v43 = vadd.f32 %v244_v35, %v180_v22  ;;  %v129_v17 = vmul.u32 2146121005, %v125_v36  ;;  %v197_v44 = vmul.u32 2146121005, %v193_v37 }
  0x36   :  { %v69_v46 = vxor.u32 %v65_v39, %v61_v31  ;;  %v265_v47 = vmul.u32 2146121005, %v261_v40  ;;  %v58_v48 = vxor.u32 %v54_v41, %v50_v33  ;;  %v118_v49 = vadd.s32 2242054355, %v447_v21 }
  0x37   :  { %v335_v50 = vadd.f32 1.0, %v331_v42  ;;  %v316_v51 = vadd.f32 %v312_v38, %v248_v43  ;;  %v133_v52 = vshrl.u32 %v129_v17, 15  ;;  %v201_v53 = vshrl.u32 %v197_v44, 15 }
  0x38   :  { %v73_v54 = vmul.u32 2221713035, %v69_v46  ;;  %v269_v55 = vshrl.u32 %v265_v47, 15  ;;  %v62_v56 = vmul.u32 2146121005, %v58_v48  ;;  %v122_v57 = vshrl.u32 %v118_v49, 16 }
  0x39   :  { %v339_v58 = vmul.f32 %v335_v50, %v327_v45  ;;  %v365_v59 = vadd.f32 -4.0, %v316_v51  ;;  %v137_v60 = vxor.u32 %v133_v52, %v129_v17  ;;  %v205_v61 = vxor.u32 %v201_v53, %v197_v44 }
  0x3a   :  { %v77_v62 = vshrl.u32 %v73_v54, 16  ;;  %v273_v63 = vxor.u32 %v269_v55, %v265_v47  ;;  %v66_v0 = vshrl.u32 %v62_v56, 15  ;;  %v126_v1 = vxor.u32 %v122_v57, %v118_v49 }
  0x3b   :  { %343 = vst [vmem:[#allocation7] sm:$0xff] %v339_v58  ;;  %v324_v2 = vmul.f32 1.2247449, %v365_v59  ;;  %v141_v3 = vmul.u32 2221713035, %v137_v60 }
  0x3c   :  { %v81_v4 = vxor.u32 %v77_v62, %v73_v54  ;;  %v209_v5 = vmul.u32 2221713035, %v205_v61  ;;  %v277_v6 = vmul.u32 2221713035, %v273_v63  ;;  %v70_v7 = vxor.u32 %v66_v0, %v62_v56 }
  0x3d   :  { %v332_v8 = vmul.f32 0.1, %v324_v2  ;;  %v145_v10 = vshrl.u32 %v141_v3, 16  ;;  %v130_v11 = vmul.u32 2146121005, %v126_v1 }
  0x3e   :  { %v85_v14 = vand.u32 65535, %v81_v4  ;;  %v93_v15 = vshrl.u32 %v81_v4, 16  ;;  %v213_v9 = vshrl.u32 %v209_v5, 16  ;;  %v281_v16 = vshrl.u32 %v277_v6, 16 }
  0x3f   :  { %v336_v18 = vadd.f32 1.0, %v332_v8  ;;  %v149_v19 = vxor.u32 %v145_v10, %v141_v3  ;;  %v74_v13 = vmul.u32 2221713035, %v70_v7  ;;  %v134_v20 = vshrl.u32 %v130_v11, 15 }
  0x40   :  { %v89_v22 = vcvt.s32.f32 %v85_v14  ;;  %v97_v23 = vcvt.s32.f32 %v93_v15  ;;  %v217_v24 = vxor.u32 %v213_v9, %v209_v5  ;;  %v285_v25 = vxor.u32 %v281_v16, %v277_v6 }
  0x41   :  { %v340_v26 = vmul.f32 %v336_v18, %v328_v12  ;;  %v153_v27 = vand.u32 65535, %v149_v19  ;;  %v161_v28 = vshrl.u32 %v149_v19, 16  ;;  %v78_v29 = vshrl.u32 %v74_v13, 16 }
  0x42   :  { %v101_v30 = vadd.f32 %v97_v23, %v89_v22  ;;  %v221_v31 = vand.u32 65535, %v217_v24  ;;  %v229_v32 = vshrl.u32 %v217_v24, 16  ;;  %v289_v33 = vand.u32 65535, %v285_v25 }
  0x43   :  { %344 = vst [vmem:[#allocation7 + $0x8] sm:$0xff] %v340_v26  ;;  %v157_v34 = vcvt.s32.f32 %v153_v27  ;;  %v165_v35 = vcvt.s32.f32 %v161_v28  ;;  %v297_v36 = vshrl.u32 %v285_v25, 16  ;;  %v82_v43 = vxor.u32 %v78_v29, %v74_v13  ;;  %v329_v26 = vld [vmem:[#allocation4 + $0x10] sm:$0xff] }
  0x44   :  { %v105_v37 = vadd.f32 1.0, %v101_v30  ;;  %v225_v38 = vcvt.s32.f32 %v221_v31  ;;  %v233_v39 = vcvt.s32.f32 %v229_v32  ;;  %v293_v40 = vcvt.s32.f32 %v289_v33 }
  0x45   :  { %v169_v41 = vadd.f32 %v165_v35, %v157_v34  ;;  %v301_v42 = vcvt.s32.f32 %v297_v36  ;;  %v138_v44 = vxor.u32 %v134_v20, %v130_v11  ;;  %v186_v45 = vadd.s32 320440878, %v447_v21 }
  0x46   :  { %v237_v17 = vadd.f32 %v233_v39, %v225_v38  ;;  %v109_v46 = vmul.f32 1.5258789e-05, %v105_v37  ;;  %v254_v52 = vadd.s32 57701188, %v447_v21  ;;  %v86_v55 = vand.u32 65535, %v82_v43 }
  0x47   :  { %v173_v47 = vadd.f32 1.0, %v169_v41  ;;  %v305_v48 = vadd.f32 %v301_v42, %v293_v40  ;;  %v142_v50 = vmul.u32 2221713035, %v138_v44  ;;  %v190_v51 = vshrl.u32 %v186_v45, 16 }
  0x48   :  { %v241_v49 = vadd.f32 1.0, %v237_v17  ;;  %v94_v56 = vshrl.u32 %v82_v43, 16  ;;  %v258_v60 = vshrl.u32 %v254_v52, 16  ;;  %v90_v3 = vcvt.s32.f32 %v86_v55 }
  0x49   :  { %v177_v53 = vmul.f32 1.5258789e-05, %v173_v47  ;;  %v309_v54 = vadd.f32 1.0, %v305_v48  ;;  %v146_v58 = vshrl.u32 %v142_v50, 16  ;;  %v194_v59 = vxor.u32 %v190_v51, %v186_v45 }
  0x4a   :  { %v245_v57 = vmul.f32 1.5258789e-05, %v241_v49  ;;  %v262_v1 = vxor.u32 %v258_v60, %v254_v52  ;;  %v98_v4 = vcvt.s32.f32 %v94_v56 }
  0x4b   :  { %v181_v61 = vadd.f32 %v177_v53, %v109_v46  ;;  %v313_v62 = vmul.f32 1.5258789e-05, %v309_v54  ;;  %v150_v63 = vxor.u32 %v146_v58, %v142_v50  ;;  %v198_v0 = vmul.u32 2146121005, %v194_v59  ;;  %v330_v53 = vld [vmem:[#allocation4 + $0x18] sm:$0xff] }
  0x4c   :  { %v266_v21 = vmul.u32 2146121005, %v262_v1  ;;  %v102_v9 = vadd.f32 %v98_v4, %v90_v3 }
  0x4d   :  { %v249_v2 = vadd.f32 %v245_v57, %v181_v61  ;;  %v154_v5 = vand.u32 65535, %v150_v63  ;;  %v162_v6 = vshrl.u32 %v150_v63, 16  ;;  %v202_v7 = vshrl.u32 %v198_v0, 15 }
  0x4e   :  { %v270_v14 = vshrl.u32 %v266_v21, 15  ;;  %v106_v24 = vadd.f32 1.0, %v102_v9 }
  0x4f   :  { %v317_v8 = vadd.f32 %v313_v62, %v249_v2  ;;  %v158_v10 = vcvt.s32.f32 %v154_v5  ;;  %v166_v11 = vcvt.s32.f32 %v162_v6  ;;  %v206_v12 = vxor.u32 %v202_v7, %v198_v0 }
  0x50   :  { %v274_v19 = vxor.u32 %v270_v14, %v266_v21  ;;  %v110_v34 = vmul.f32 1.5258789e-05, %v106_v24 }
  0x51   :  { %v366_v15 = vadd.f32 -4.0, %v317_v8  ;;  %v170_v16 = vadd.f32 %v166_v11, %v158_v10  ;;  %v210_v18 = vmul.u32 2221713035, %v206_v12 }
  0x52   :  { %v278_v22 = vmul.u32 2221713035, %v274_v19 }
  0x53   :  { %v325_v13 = vmul.f32 1.2247449, %v366_v15  ;;  %v214_v20 = vshrl.u32 %v210_v18, 16  ;;  %v174_v25 = vadd.f32 1.0, %v170_v16 }
  0x54   :  { %v282_v28 = vshrl.u32 %v278_v22, 16 }
  0x55   :  { %v333_v23 = vmul.f32 0.1, %v325_v13  ;;  %v218_v27 = vxor.u32 %v214_v20, %v210_v18  ;;  %v178_v35 = vmul.f32 1.5258789e-05, %v174_v25 }
  0x56   :  { %v286_v32 = vxor.u32 %v282_v28, %v278_v22 }
  0x57   :  { %v337_v29 = vadd.f32 1.0, %v333_v23  ;;  %v222_v30 = vand.u32 65535, %v218_v27  ;;  %v230_v31 = vshrl.u32 %v218_v27, 16  ;;  %v182_v43 = vadd.f32 %v178_v35, %v110_v34 }
  0x58   :  { %v290_v38 = vand.u32 65535, %v286_v32  ;;  %v298_v39 = vshrl.u32 %v286_v32, 16 }
  0x59   :  { %v341_v33 = vmul.f32 %v337_v29, %v329_v26  ;;  %v226_v36 = vcvt.s32.f32 %v222_v30  ;;  %v234_v37 = vcvt.s32.f32 %v230_v31 }
  0x5a   :  { %v294_v41 = vcvt.s32.f32 %v290_v38  ;;  %v302_v42 = vcvt.s32.f32 %v298_v39 }
  0x5b   :  { %345 = vst [vmem:[#allocation7 + $0x10] sm:$0xff] %v341_v33  ;;  %v238_v40 = vadd.f32 %v234_v37, %v226_v36 }
  0x5c   :  { %v306_v44 = vadd.f32 %v302_v42, %v294_v41 }
  0x5d   :  { %v242_v17 = vadd.f32 1.0, %v238_v40 }
  0x5e   :  { %v310_v46 = vadd.f32 1.0, %v306_v44 }
  0x5f   :  { %v246_v45 = vmul.f32 1.5258789e-05, %v242_v17 }
  0x60   :  { %v314_v48 = vmul.f32 1.5258789e-05, %v310_v46 }
  0x61   :  { %v250_v47 = vadd.f32 %v246_v45, %v182_v43 }
  0x63   :  { %v318_v49 = vadd.f32 %v314_v48, %v250_v47 }
  0x65   :  { %v367_v50 = vadd.f32 -4.0, %v318_v49 }
  0x67   :  { %v326_v51 = vmul.f32 1.2247449, %v367_v50 }
  0x69   :  { %v334_v52 = vmul.f32 0.1, %v326_v51 }
  0x6b   :  { %v338_v54 = vadd.f32 1.0, %v334_v52 }
  0x6d   :  { %v342_v55 = vmul.f32 %v338_v54, %v330_v53 }
  0x6f   :  { %346 = vst [vmem:[#allocation7 + $0x18] sm:$0xff] %v342_v55 }
  0x70   :  { %357 = dma.vmem_to_hbm [thread:$0]  %s353_s1, 512, %s355_s19, [#allocation6]  }
  0x71   :  { %420 = dma.done.wait [#allocation6], 512  }
  0x72   :  { %421 = vsyncadd [#allocation6], 4294966784 }
  0x73   :  { %362 = vsyncpa [#allocation5], 1 }
  0x74   :  { %363 = vsyncpa [#allocation6], 1 }

</bundles_post_ra>
